<compile_context>
chip_gen: v7x
topology: tpu7x:2x2x1
jax: 0.10.0
libtpu: 0.0.40
codegen_flags: <defaults>
</compile_context>

<pallas_src>
import jax
import jax.numpy as jnp
import numpy as np
from jax.experimental import pallas as pl
from jax.experimental.pallas import tpu as pltpu


def _round_up(n, m):
    return ((n + m - 1) // m) * m


def _mlp_kernel(xT_ref,
                w1_ref, b1_ref,
                w2_ref, b2_ref,
                w3_ref, b3_ref,
                o_ref):
    """One batch tile (batch on lanes) of the whole MLP.

    xT_ref : [D,  Bt] bf16      w*_ref : [out, in] bf16 (BN folded in)
    b*_ref : [out, 1] f32       o_ref  : [Kp, Bt] f32
    3 MXU matmuls (bf16 in, f32 acc) + ReLU + numerically stable softplus.
    """
    xT = xT_ref[...]

    # Layer 1: Linear -> ReLU   (BN1 affine folded into layer 2's weights)
    h = jnp.dot(w1_ref[...], xT, preferred_element_type=jnp.float32) + b1_ref[...]
    h = jnp.maximum(h, 0.0).astype(jnp.bfloat16)

    # Layer 2: Linear -> ReLU   (BN2 affine folded into layer 3's weights)
    h = jnp.dot(w2_ref[...], h, preferred_element_type=jnp.float32) + b2_ref[...]
    h = jnp.maximum(h, 0.0).astype(jnp.bfloat16)

    # Output head: Linear -> softplus (stable form), all in f32.
    logits = jnp.dot(w3_ref[...], h, preferred_element_type=jnp.float32) + b3_ref[...]
    hazard = jnp.maximum(logits, 0.0) + jnp.log1p(jnp.exp(-jnp.abs(logits)))

    o_ref[...] = hazard.astype(o_ref.dtype)


def fold_bn_into_linears(params):
    """Fold eval-mode BatchNorm affine into the *next* Linear layer.

    h_bn = relu(z) * s + t  =>  h_bn @ W + b == relu(z) @ (diag(s) @ W) + (t @ W + b)
    Exact for any sign of gamma (folding happens after the ReLU).
    """
    w2 = params["bn1_scale"].reshape(-1, 1) * params["w2"]
    b2 = params["b2"] + params["bn1_shift"] @ params["w2"]
    w3 = params["bn2_scale"].reshape(-1, 1) * params["w3"]
    b3 = params["b3"] + params["bn2_shift"] @ params["w3"]
    return {"w1": params["w1"], "b1": params["b1"],
            "w2": w2, "b2": b2, "w3": w3, "b3": b3}


def prepare_kernel_params(params):
    """Fold BN, transpose weights to [out, in], cast to bf16, pad K to mult-of-8."""
    fp = fold_bn_into_linears(params)
    K = fp["w3"].shape[1]
    Kp = _round_up(K, 8)
    w3 = jnp.pad(fp["w3"], ((0, 0), (0, Kp - K)))
    b3 = jnp.pad(fp["b3"], ((0, 0), (0, Kp - K)))
    return {
        "w1T": fp["w1"].T.astype(jnp.bfloat16),
        "b1":  fp["b1"].reshape(-1, 1).astype(jnp.float32),
        "w2T": fp["w2"].T.astype(jnp.bfloat16),
        "b2":  fp["b2"].reshape(-1, 1).astype(jnp.float32),
        "w3T": w3.T.astype(jnp.bfloat16),
        "b3":  b3.reshape(-1, 1).astype(jnp.float32),
        "n_intervals": K,
    }


def discrete_time_neural_survival(x, kp, *, block_b=4096):
    """Forward pass via pallas_call.

    x  : [B, D] float32
    kp : dict from prepare_kernel_params().
    block_b : lane-axis (batch) tile size; rounded to a multiple of 128 and
              capped so large batches split into >= 2 tiles (v7x dual-TC).
    """
    B, D = x.shape
    H = kp["w1T"].shape[0]
    Kp = kp["w3T"].shape[0]
    K = kp["n_intervals"]

    # Lane tile: multiple of 128; at most ~half the batch (>= 2 'parallel'
    # steps on big B so v7x can shard across its two TensorCores).
    half = _round_up(-(-B // 2), 128)
    block_b = min(_round_up(max(block_b, 128), 128), max(half, 128))
    Bp = _round_up(B, block_b)

    xT = x.T.astype(jnp.bfloat16)                        # [D, B] bf16
    if Bp != B:
        xT = jnp.pad(xT, ((0, 0), (0, Bp - B)))
    grid = (Bp // block_b,)

    def full_spec(shape):
        # Parameters are tiny and resident: one full-extent block, index
        # never changes so they are DMA'd once.
        return pl.BlockSpec(shape, lambda i: (0,) * len(shape))

    flops = 2 * Bp * (D * H + H * H + H * Kp)
    bytes_accessed = (2 * (Bp * D + D * H + H * H + H * Kp)     # bf16 x + weights
                      + 4 * (2 * H + Kp)                        # f32 biases
                      + 4 * Bp * Kp)                            # f32 output
    cost = pl.CostEstimate(flops=flops,
                           transcendentals=2 * Bp * Kp,         # exp + log1p
                           bytes_accessed=bytes_accessed)

    outT = pl.pallas_call(
        _mlp_kernel,
        out_shape=jax.ShapeDtypeStruct((Kp, Bp), jnp.float32),
        grid_spec=pltpu.PrefetchScalarGridSpec(
            num_scalar_prefetch=0,
            grid=grid,
            in_specs=[
                pl.BlockSpec((D, block_b), lambda i: (0, i)),   # xT tile (streamed)
                full_spec((H, D)),                              # w1T
                full_spec((H, 1)),                              # b1
                full_spec((H, H)),                              # w2T (BN1 folded)
                full_spec((H, 1)),                              # b2  (BN1 folded)
                full_spec((Kp, H)),                             # w3T (BN2 folded)
                full_spec((Kp, 1)),                             # b3  (BN2 folded)
            ],
            out_specs=pl.BlockSpec((Kp, block_b), lambda i: (0, i)),
        ),
        compiler_params=pltpu.CompilerParams(
            dimension_semantics=("parallel",)),
        cost_estimate=cost,
    )(xT, kp["w1T"], kp["b1"], kp["w2T"], kp["b2"], kp["w3T"], kp["b3"])

    # Strip K padding / batch padding and return [B, K].
    return outT[:K, :B].T


def init_params(key, input_dim, hidden_dim, n_intervals):
    """Deterministic synthetic parameters (PyTorch-style uniform fan-in init)."""
    def linear(key, fan_in, fan_out):
        kw, kb = jax.random.split(key)
        bound = 1.0 / np.sqrt(fan_in)
        # Stored in [in, out] orientation; transposed later for the kernel.
        w = jax.random.uniform(kw, (fan_in, fan_out), jnp.float32, -bound, bound)
        b = jax.random.uniform(kb, (1, fan_out), jnp.float32, -bound, bound)
        return w, b

    k1, k2, k3 = jax.random.split(key, 3)
    w1, b1 = linear(k1, input_dim, hidden_dim)
    w2, b2 = linear(k2, hidden_dim, hidden_dim)
    w3, b3 = linear(k3, hidden_dim, n_intervals)

    # BatchNorm1d defaults: gamma=1, beta=0, running_mean=0, running_var=1.
    eps = 1e-5
    gamma = jnp.ones((1, hidden_dim), jnp.float32)
    beta = jnp.zeros((1, hidden_dim), jnp.float32)
    running_mean = jnp.zeros((1, hidden_dim), jnp.float32)
    running_var = jnp.ones((1, hidden_dim), jnp.float32)
    scale = gamma / jnp.sqrt(running_var + eps)
    shift = beta - running_mean * scale

    return {"w1": w1, "b1": b1, "bn1_scale": scale, "bn1_shift": shift,
            "w2": w2, "b2": b2, "bn2_scale": scale, "bn2_shift": shift,
            "w3": w3, "b3": b3}


def reference_forward_f32(x, p):
    """Pure-JAX f32 reference with UNFOLDED BatchNorm (eval-mode semantics)."""
    h = jnp.maximum(x @ p["w1"] + p["b1"], 0.0) * p["bn1_scale"] + p["bn1_shift"]
    h = jnp.maximum(h @ p["w2"] + p["b2"], 0.0) * p["bn2_scale"] + p["bn2_shift"]
    logits = h @ p["w3"] + p["b3"]
    return jnp.maximum(logits, 0.0) + jnp.log1p(jnp.exp(-jnp.abs(logits)))


def reference_forward_mirror(x, kp):
    """Pure-JAX mirror of the kernel math (folded BN, bf16 operands, f32 acc)."""
    xT = x.T.astype(jnp.bfloat16)
    h = jnp.dot(kp["w1T"], xT, preferred_element_type=jnp.float32) + kp["b1"]
    h = jnp.maximum(h, 0.0).astype(jnp.bfloat16)
    h = jnp.dot(kp["w2T"], h, preferred_element_type=jnp.float32) + kp["b2"]
    h = jnp.maximum(h, 0.0).astype(jnp.bfloat16)
    logits = jnp.dot(kp["w3T"], h, preferred_element_type=jnp.float32) + kp["b3"]
    hz = jnp.maximum(logits, 0.0) + jnp.log1p(jnp.exp(-jnp.abs(logits)))
    return hz[:kp["n_intervals"]].T


if __name__ == "__main__":
    key = jax.random.PRNGKey(0)

    # --- Case 1: small shapes consistent with the module (B=8, D=16, H=32, K=16)
    B, D, H, K = 8, 16, 32, 16
    kx, kp_key, key = jax.random.split(key, 3)
    x = jax.random.normal(kx, (B, D), jnp.float32)
    params = init_params(kp_key, D, H, K)
    kparams = prepare_kernel_params(params)

    out = jax.block_until_ready(discrete_time_neural_survival(x, kparams))
    assert out.shape == (B, K)
    mirror = jax.block_until_ready(reference_forward_mirror(x, kparams))
    np.testing.assert_allclose(np.asarray(out), np.asarray(mirror),
                               rtol=2e-3, atol=2e-3)
    ref = jax.block_until_ready(reference_forward_f32(x, params))
    np.testing.assert_allclose(np.asarray(out), np.asarray(ref),
                               rtol=5e-2, atol=5e-2)

    # --- Case 2: module defaults (hidden=64, K=50), non-divisor batch to
    #             exercise K/batch padding + a multi-step 'parallel' grid.
    B2, D2, H2, K2 = 2000, 16, 64, 50
    kx2, kp2_key = jax.random.split(key)
    x2 = jax.random.normal(kx2, (B2, D2), jnp.float32)
    params2 = init_params(kp2_key, D2, H2, K2)
    kparams2 = prepare_kernel_params(params2)

    out2 = jax.block_until_ready(
        discrete_time_neural_survival(x2, kparams2, block_b=4096))
    assert out2.shape == (B2, K2)
    mirror2 = jax.block_until_ready(reference_forward_mirror(x2, kparams2))
    np.testing.assert_allclose(np.asarray(out2), np.asarray(mirror2),
                               rtol=2e-3, atol=2e-3)
    ref2 = jax.block_until_ready(reference_forward_f32(x2, params2))
    np.testing.assert_allclose(np.asarray(out2), np.asarray(ref2),
                               rtol=5e-2, atol=5e-2)

    print("KERNEL_OK")
</pallas_src>

<mosaic_0001>
module attributes {stable_mosaic.version = 11 : i64} {
  func.func @_mlp_kernel(%arg0: i32, %arg1: memref<16x128xbf16, #tpu.memory_space<vmem>>, %arg2: memref<32x16xbf16, #tpu.memory_space<vmem>>, %arg3: memref<32x1xf32, #tpu.memory_space<vmem>>, %arg4: memref<32x32xbf16, #tpu.memory_space<vmem>>, %arg5: memref<32x1xf32, #tpu.memory_space<vmem>>, %arg6: memref<16x32xbf16, #tpu.memory_space<vmem>>, %arg7: memref<16x1xf32, #tpu.memory_space<vmem>>, %arg8: memref<16x128xf32, #tpu.memory_space<vmem>>) attributes {dimension_semantics = [#tpu.dimension_semantics<parallel>], iteration_bounds = array<i64: 1>, scalar_prefetch = 0 : i64, scratch_operands = 0 : i64, tpu.core_type = #tpu.core_type<tc>, window_params = [{transform_indices = @transform_0, window_bounds = array<i64: 16, 128>}, {pipeline_mode = #tpu.pipeline_mode<synchronous>, transform_indices = @transform_1, window_bounds = array<i64: 32, 16>}, {pipeline_mode = #tpu.pipeline_mode<synchronous>, transform_indices = @transform_2, window_bounds = array<i64: 32, 1>}, {pipeline_mode = #tpu.pipeline_mode<synchronous>, transform_indices = @transform_3, window_bounds = array<i64: 32, 32>}, {pipeline_mode = #tpu.pipeline_mode<synchronous>, transform_indices = @transform_4, window_bounds = array<i64: 32, 1>}, {pipeline_mode = #tpu.pipeline_mode<synchronous>, transform_indices = @transform_5, window_bounds = array<i64: 16, 32>}, {pipeline_mode = #tpu.pipeline_mode<synchronous>, transform_indices = @transform_6, window_bounds = array<i64: 16, 1>}, {transform_indices = @transform_7, window_bounds = array<i64: 16, 128>}]} {
    %c0 = arith.constant 0 : index
    %c0_0 = arith.constant 0 : index
    %0 = vector.load %arg1[%c0, %c0_0] : memref<16x128xbf16, #tpu.memory_space<vmem>>, vector<16x128xbf16>
    %c0_1 = arith.constant 0 : index
    %c0_2 = arith.constant 0 : index
    %1 = vector.load %arg2[%c0_1, %c0_2] : memref<32x16xbf16, #tpu.memory_space<vmem>>, vector<32x16xbf16>
    %cst = arith.constant dense<0.000000e+00> : vector<32x128xf32>
    %2 = tpu.matmul %1, %0, %cst {dimension_numbers = #tpu.dot_dimension_numbers<[1], [0], [0], [1], [0, 0, 1, 1], [], []>} : vector<32x16xbf16>, vector<16x128xbf16>, vector<32x128xf32> -> vector<32x128xf32>
    %c0_3 = arith.constant 0 : index
    %c0_4 = arith.constant 0 : index
    %3 = vector.load %arg3[%c0_3, %c0_4] : memref<32x1xf32, #tpu.memory_space<vmem>>, vector<32x1xf32>
    %4 = vector.broadcast %3 : vector<32x1xf32> to vector<32x128xf32>
    %5 = arith.addf %2, %4 : vector<32x128xf32>
    %cst_5 = arith.constant 0.000000e+00 : f32
    %6 = vector.broadcast %cst_5 : f32 to vector<32x128xf32>
    %7 = arith.maximumf %5, %6 : vector<32x128xf32>
    %8 = arith.truncf %7 : vector<32x128xf32> to vector<32x128xbf16>
    %c0_6 = arith.constant 0 : index
    %c0_7 = arith.constant 0 : index
    %9 = vector.load %arg4[%c0_6, %c0_7] : memref<32x32xbf16, #tpu.memory_space<vmem>>, vector<32x32xbf16>
    %cst_8 = arith.constant dense<0.000000e+00> : vector<32x128xf32>
    %10 = tpu.matmul %9, %8, %cst_8 {dimension_numbers = #tpu.dot_dimension_numbers<[1], [0], [0], [1], [0, 0, 1, 1], [], []>} : vector<32x32xbf16>, vector<32x128xbf16>, vector<32x128xf32> -> vector<32x128xf32>
    %c0_9 = arith.constant 0 : index
    %c0_10 = arith.constant 0 : index
    %11 = vector.load %arg5[%c0_9, %c0_10] : memref<32x1xf32, #tpu.memory_space<vmem>>, vector<32x1xf32>
    %12 = vector.broadcast %11 : vector<32x1xf32> to vector<32x128xf32>
    %13 = arith.addf %10, %12 : vector<32x128xf32>
    %cst_11 = arith.constant 0.000000e+00 : f32
    %14 = vector.broadcast %cst_11 : f32 to vector<32x128xf32>
    %15 = arith.maximumf %13, %14 : vector<32x128xf32>
    %16 = arith.truncf %15 : vector<32x128xf32> to vector<32x128xbf16>
    %c0_12 = arith.constant 0 : index
    %c0_13 = arith.constant 0 : index
    %17 = vector.load %arg6[%c0_12, %c0_13] : memref<16x32xbf16, #tpu.memory_space<vmem>>, vector<16x32xbf16>
    %cst_14 = arith.constant dense<0.000000e+00> : vector<16x128xf32>
    %18 = tpu.matmul %17, %16, %cst_14 {dimension_numbers = #tpu.dot_dimension_numbers<[1], [0], [0], [1], [0, 0, 1, 1], [], []>} : vector<16x32xbf16>, vector<32x128xbf16>, vector<16x128xf32> -> vector<16x128xf32>
    %c0_15 = arith.constant 0 : index
    %c0_16 = arith.constant 0 : index
    %19 = vector.load %arg7[%c0_15, %c0_16] : memref<16x1xf32, #tpu.memory_space<vmem>>, vector<16x1xf32>
    %20 = vector.broadcast %19 : vector<16x1xf32> to vector<16x128xf32>
    %21 = arith.addf %18, %20 : vector<16x128xf32>
    %cst_17 = arith.constant 0.000000e+00 : f32
    %22 = vector.broadcast %cst_17 : f32 to vector<16x128xf32>
    %23 = arith.maximumf %21, %22 : vector<16x128xf32>
    %24 = math.absf %21 : vector<16x128xf32>
    %cst_18 = arith.constant 0.000000e+00 : f32
    %25 = vector.broadcast %cst_18 : f32 to vector<16x128xf32>
    %26 = arith.subf %25, %24 : vector<16x128xf32>
    %27 = math.exp %26 : vector<16x128xf32>
    %28 = math.log1p %27 : vector<16x128xf32>
    %29 = arith.addf %23, %28 : vector<16x128xf32>
    %c0_19 = arith.constant 0 : index
    %c0_20 = arith.constant 0 : index
    %30 = vector.load %arg8[%c0_19, %c0_20] : memref<16x128xf32, #tpu.memory_space<vmem>>, vector<16x128xf32>
    tpu.vector_store %arg8[%c0_19, %c0_20], %29 {strides = array<i32>} : memref<16x128xf32, #tpu.memory_space<vmem>>, vector<16x128xf32>,
    return
  }
  func.func @transform_0(%arg0: i32) -> (i32, i32) {
    %c0_i32 = arith.constant 0 : i32
    %c0_i32_0 = arith.constant 0 : i32
    return %c0_i32, %arg0 : i32, i32
  }
  func.func @transform_1(%arg0: i32) -> (i32, i32) {
    %c0_i32 = arith.constant 0 : i32
    %c0_i32_0 = arith.constant 0 : i32
    %c0_i32_1 = arith.constant 0 : i32
    return %c0_i32, %c0_i32_0 : i32, i32
  }
  func.func @transform_2(%arg0: i32) -> (i32, i32) {
    %c0_i32 = arith.constant 0 : i32
    %c0_i32_0 = arith.constant 0 : i32
    %c0_i32_1 = arith.constant 0 : i32
    return %c0_i32, %c0_i32_0 : i32, i32
  }
  func.func @transform_3(%arg0: i32) -> (i32, i32) {
    %c0_i32 = arith.constant 0 : i32
    %c0_i32_0 = arith.constant 0 : i32
    %c0_i32_1 = arith.constant 0 : i32
    return %c0_i32, %c0_i32_0 : i32, i32
  }
  func.func @transform_4(%arg0: i32) -> (i32, i32) {
    %c0_i32 = arith.constant 0 : i32
    %c0_i32_0 = arith.constant 0 : i32
    %c0_i32_1 = arith.constant 0 : i32
    return %c0_i32, %c0_i32_0 : i32, i32
  }
  func.func @transform_5(%arg0: i32) -> (i32, i32) {
    %c0_i32 = arith.constant 0 : i32
    %c0_i32_0 = arith.constant 0 : i32
    %c0_i32_1 = arith.constant 0 : i32
    return %c0_i32, %c0_i32_0 : i32, i32
  }
  func.func @transform_6(%arg0: i32) -> (i32, i32) {
    %c0_i32 = arith.constant 0 : i32
    %c0_i32_0 = arith.constant 0 : i32
    %c0_i32_1 = arith.constant 0 : i32
    return %c0_i32, %c0_i32_0 : i32, i32
  }
  func.func @transform_7(%arg0: i32) -> (i32, i32) {
    %c0_i32 = arith.constant 0 : i32
    %c0_i32_0 = arith.constant 0 : i32
    return %c0_i32, %arg0 : i32, i32
  }
}

</mosaic_0001>

<bundles_post_ra>
// kernel: tpu_custom_call.1
= control target key start
LH: loop header
LB: loop body
LE: loop exit
PB: predicated region body
PF: predicated region fallthrough
CT: control target
= control target key end

     0   :  { %vm74_vm0 = vcmask 130048   ;;  %v436_v3 = vmov 0   ;;  %s545_s0 = inlined_call_operand.vmem [shape: bf16[16,128], index: 0, kind: input, shape index: {}]   ;;  %s546_s1 = inlined_call_operand.vmem [shape: bf16[32,16], index: 1, kind: input, shape index: {}]   ;;  %s547_s2 = inlined_call_operand.vmem [shape: f32[32,1], index: 2, kind: input, shape index: {}]   ;;  %s548_s3 = inlined_call_operand.vmem [shape: bf16[32,32], index: 3, kind: input, shape index: {}]   ;;  %s549_s4 = inlined_call_operand.vmem [shape: f32[32,1], index: 4, kind: input, shape index: {}]   ;;  %s550_s5 = inlined_call_operand.vmem [shape: bf16[16,32], index: 5, kind: input, shape index: {}]   ;;  %s551_s6 = inlined_call_operand.vmem [shape: f32[16,1], index: 6, kind: input, shape index: {}]   ;;  %s552_s7 = inlined_call_operand.hbm [shape: f32[16,128], index: 7, kind: output, shape index: {}]  }
   0x1   :  { %v398_v0 = vld [vmem:[%s545_s0] sm:$0xff]   ;;  %v400_v2 = vld [vmem:[%s546_s1 + $0x8] sm:$0xff]   ;;  %396 = vset.pattern.permute.xlu0 %v436_v3  ;;  %v36_v5 = vld [vmem:[%s547_s2 + $0x10] sm:$0xff]  ;;  %397 = vset.pattern.permute.xlu1 %v436_v3 }
   0x2   :  { %v399_v1 = vld [vmem:[%s546_s1] sm:$0xff]   ;;  %368 = vmatprep.subr.bf16.mxu0 %v398_v0  ;;  %50 = vperm.xlu1 %397, %v36_v5   ;;  %v35_v6 = vld [vmem:[%s547_s2 + $0x8] sm:$0xff]  ;;  %v37_v7 = vld [vmem:[%s547_s2 + $0x18] sm:$0xff] }
   0x3   :  { %369 = vmatpush3.bf16.msra.mxu0 %v398_v0  ;;  %370 = vmatprep.mubr.msk.bf16.mxu0 %vm74_vm0, %v399_v1  ;;  %v34_v4 = vld [vmem:[%s547_s2] sm:$0xff] }
   0x4   :  { %40 = vperm.xlu0 %396, %v34_v4  }
   0x6   :  { %371 = vmatmul.mubr.msk.bf16.vlgmr.msra.gmra.mrb[0].mxu0 %vm74_vm0, %v400_v2 }
   0x8   :  { %45 = vperm.xlu0 %396, %v35_v6  }
   0x9   :  { %12 = vsyncpa [#allocation3], 0  ;;  %55 = vperm.xlu1 %397, %v37_v7   ;;  %v140_v8 = vld [vmem:[%s549_s4] sm:$0xff]  ;;  %v141_v9 = vld [vmem:[%s549_s4 + $0x8] sm:$0xff]  ;;  %vm174_vm1 = vcmask 261120   ;;  %v437_v34 = vmov 0.0  }
   0xa   :  { %v142_v10 = vld [vmem:[%s549_s4 + $0x10] sm:$0xff]  ;;  %v143_v11 = vld [vmem:[%s549_s4 + $0x18] sm:$0xff]  ;;  %v238_v12 = vld [vmem:[%s551_s6] sm:$0xff]  ;;  %382 = vmatprep.subr.bf16.mxu0 %v437_v34  ;;  %vm438_vm2 = vmmov 0  }
   0xb   :  { %v239_v13 = vld [vmem:[%s551_s6 + $0x8] sm:$0xff]  ;;  %v401_v14 = vld [vmem:[%s548_s3] sm:$0xff]   ;;  %386 = vmatprep.mubr.msk.bf16.mxu0 %vm438_vm2, %v437_v34 }
   0xc   :  { %146 = vperm.xlu0 %396, %v140_v8   ;;  %378 = vmatprep.mubr.msk.bf16.mxu1 %vm174_vm1, %v401_v14  ;;  %v402_v33 = vld [vmem:[%s548_s3 + $0x8] sm:$0xff]   ;;  %v403_v53 = vld [vmem:[%s550_s5] sm:$0xff]   ;;  %s439_s5 = smov [#allocation2]  }
   0xd   :  { %151 = vperm.xlu1 %397, %v141_v9   ;;  %s336_s27 = sshll.u32 %s439_s5, 4  ;;  %s337_s27 = int_to_ptr.vmem [resolvable:$true] %s336_s27 }
   0xe   :  { %s412_s28 = scalar_lea.vmem %s337_s27, 256  ;;  %p417_p1 = scmp.lt.s32.totalorder %s337_s27, %s337_s27 }
   0xf   :  { %p413_p0 = scmp.ne.s32.totalorder %s337_s27, %s412_s28  ;;  %p418_p2 = scmp.lt.s32.totalorder %s412_s28, %s412_s28 }
  0x10   :  { %156 = vperm.xlu0 %396, %v142_v10  }
  0x11   :  { %161 = vperm.xlu1 %397, %v143_v11   ;;  %p419_p3 = por %p418_p2, %p417_p1 }
  0x13   :  { %p420_p4 = pnand %p419_p3, %p413_p0 }
  0x14   :  { %242 = vperm.xlu0 %396, %v238_v12  }
  0x15   :  { %247 = vperm.xlu1 %397, %v239_v13  }
  0x81   :  { %v51_v15 = vpop.permute.xlu1 %50 }
  0x83   :  { %v41_v16 = vpop.permute.xlu0 %40 }
  0x87   :  { %v46_v23 = vpop.permute.xlu0 %45 }
  0x88   :  { %v56_v20 = vpop.permute.xlu1 %55 }
  0x8b   :  { %v147_v35 = vpop.permute.xlu0 %146 }
  0x8c   :  { %v152_v36 = vpop.permute.xlu1 %151 }
  0x8f   :  { %v157_v37 = vpop.permute.xlu0 %156 }
  0x90   :  { %v162_v41 = vpop.permute.xlu1 %161 }
  0x93   :  { %v243_v54 = vpop.permute.xlu0 %242 }
  0x94   :  { %v248_v58 = vpop.permute.xlu1 %247 }
  0xd9   :  { %v372_v17 = vpop.f32.mrb[0].mxu0 }
  0xda   :  { %v124_v18 = vadd.f32 %v372_v17, %v51_v15  ;;  %v115_v19 = vpop.f32.mrb[1].mxu0 }
  0xdb   :  { %v116_v21 = vadd.f32 %v115_v19, %v41_v16  ;;  %v373_v22 = vpop.f32.mrb[2].mxu0 }
  0xdc   :  { %v127_v24 = vadd.f32 %v373_v22, %v56_v20  ;;  %v118_v25 = vpop.f32.mrb[3].mxu0  ;;  %v132_v27 = vmax.f32 %v124_v18, 0.0 }
  0xdd   :  { %v119_v26 = vadd.f32 %v118_v25, %v46_v23  ;;  %v130_v29 = vmax.f32 %v116_v21, 0.0 }
  0xde   :  { %v133_v28 = vmax.f32 %v127_v24, 0.0 }
  0xdf   :  { %v131_v30 = vmax.f32 %v119_v26, 0.0 }
  0xe0   :  { %v135_v31 = vpack.c.bf16 %v133_v28, %v132_v27 }
  0xe1   :  { %v134_v32 = vpack.c.bf16 %v131_v30, %v130_v29 }
  0xe3   :  { %374 = vmatprep.subr.bf16.mxu1 %v134_v32 }
  0xe4   :  { %375 = vmatpush3.bf16.msra.mxu1 %v134_v32 }
  0xe5   :  { %376 = vmatprep.subr.bf16.mxu1 %v135_v31 }
  0xe8   :  { %377 = vmatpush3.bf16.msra.mxu1 %v135_v31 }
  0xeb   :  { %379 = vmatmul.mubr.msk.bf16.vlgmr.msra.gmra.mrb[0].mxu1 %vm174_vm1, %v402_v33 }
 0x1be   :  { %v380_v38 = vpop.f32.mrb[0].mxu1 }
 0x1bf   :  { %v224_v39 = vadd.f32 %v380_v38, %v157_v37  ;;  %v215_v40 = vpop.f32.mrb[1].mxu1 }
 0x1c0   :  { %v216_v42 = vadd.f32 %v215_v40, %v147_v35  ;;  %v381_v43 = vpop.f32.mrb[2].mxu1 }
 0x1c1   :  { %v227_v44 = vadd.f32 %v381_v43, %v162_v41  ;;  %v218_v45 = vpop.f32.mrb[3].mxu1  ;;  %v232_v47 = vmax.f32 %v224_v39, 0.0 }
 0x1c2   :  { %v219_v46 = vadd.f32 %v218_v45, %v152_v36  ;;  %v230_v49 = vmax.f32 %v216_v42, 0.0 }
 0x1c3   :  { %v233_v48 = vmax.f32 %v227_v44, 0.0 }
 0x1c4   :  { %v231_v50 = vmax.f32 %v219_v46, 0.0 }
 0x1c5   :  { %v235_v51 = vpack.c.bf16 %v233_v48, %v232_v47 }
 0x1c6   :  { %v234_v52 = vpack.c.bf16 %v231_v50, %v230_v49 }
 0x1c8   :  { %383 = vmatpush3.bf16.msra.mxu0 %v234_v52 }
 0x1c9   :  { %384 = vmatprep.subr.bf16.mxu0 %v437_v34 }
 0x1cc   :  { %385 = vmatpush3.bf16.msra.mxu0 %v235_v51 }
 0x1cf   :  { %387 = vmatmul.mubr.msk.bf16.vlgmr.msra.gmra.mrb[4].mxu0 %vm174_vm1, %v403_v53 }
 0x2a2   :  { %v292_v55 = vpop.f32.mrb[4].mxu0 }
 0x2a3   :  { %v293_v56 = vadd.f32 %v292_v55, %v243_v54  ;;  %v388_v57 = vpop.f32.mrb[5].mxu0 }
 0x2a4   :  { %v295_v59 = vpop.f32.mrb[6].mxu0 }
 0x2a5   :  { %v301_v60 = vand.u32 2147483647, %v293_v56  ;;  %v296_v61 = vadd.f32 %v295_v59, %v248_v58  ;;  %v389_v62 = vpop.f32.mrb[7].mxu0  ;;  %v299_v18 = vmax.f32 %v293_v56, 0.0 }
 0x2a7   :  { %v303_v63 = vsub.f32 0.0, %v301_v60  ;;  %v302_v0 = vand.u32 2147483647, %v296_v61  ;;  %v300_v23 = vmax.f32 %v296_v61, 0.0 }
 0x2a9   :  { %v305_v1 = vmul.f32 1.442695, %v303_v63  ;;  %v304_v2 = vsub.f32 0.0, %v302_v0 }
 0x2ab   :  { %404 = vpow2.f32 %v305_v1  ;;  %v307_v3 = vmul.f32 1.442695, %v304_v2 }
 0x2ad   :  { %406 = vpow2.f32 %v307_v3 }
 0x2b5   :  { %v405_v4 = vpop.eup %404 }
 0x2b6   :  { %v309_v5 = vadd.f32 1.0, %v405_v4  ;;  %v312_v8 = vmul.f32 -0.5, %v405_v4  ;;  %v315_v11 = vand.u32 2147483647, %v405_v4 }
 0x2b7   :  { %v407_v6 = vpop.eup %406 }
 0x2b8   :  { %408 = vlog2.f32 %v309_v5  ;;  %v318_v7 = vadd.f32 1.0, %v407_v6  ;;  %v321_v9 = vmul.f32 -0.5, %v407_v6  ;;  %v313_v10 = vadd.f32 1.0, %v312_v8 }
 0x2b9   :  { %v324_v14 = vand.u32 2147483647, %v407_v6  ;;  %vm316_vm3 = vcmp.lt.f32.partialorder %v315_v11, 0.0004427343 }
 0x2ba   :  { %410 = vlog2.f32 %v318_v7  ;;  %v322_v12 = vadd.f32 1.0, %v321_v9  ;;  %v314_v16 = vmul.f32 %v405_v4, %v313_v10 }
 0x2bb   :  { %vm325_vm4 = vcmp.lt.f32.partialorder %v324_v14, 0.0004427343 }
 0x2bc   :  { %v323_v21 = vmul.f32 %v407_v6, %v322_v12 }
 0x2c2   :  { %v409_v13 = vpop.eup %408 }
 0x2c3   :  { %v311_v15 = vmul.f32 0.6931472, %v409_v13 }
 0x2c4   :  { %v411_v17 = vpop.eup %410 }
 0x2c5   :  { %v317_v19 = vsel %vm316_vm3, %v314_v16, %v311_v15  ;;  %v320_v20 = vmul.f32 0.6931472, %v411_v17 }
 0x2c6   :  { %v327_v22 = vadd.f32 %v317_v19, %v299_v18 }
 0x2c7   :  { %v326_v24 = vsel %vm325_vm4, %v323_v21, %v320_v20 }
 0x2c8   :  { %329 = vst [vmem:[#allocation2] sm:$0xff] %v327_v22  ;;  %v328_v25 = vadd.f32 %v326_v24, %v300_v23 }
 0x2ca   :  { %330 = vst [vmem:[#allocation2 + $0x8] sm:$0xff] %v328_v25 }
 0x2cb   :  { %423 = shalt.err (!%p420_p4)
}
 0x2cc   :  { %s424_s8 = scalar_lea.hbm %s552_s7, 256 }
 0x2cd   :  { %p425_p5 = scmp.ne.s32.totalorder %s552_s7, %s424_s8  ;;  %p428_p6 = scmp.lt.u32.totalorder %s424_s8, %s552_s7 }
 0x2cf   :  { %p430_p7 = pnand %p428_p6, %p425_p5 }
 0x2d1   :  { %433 = shalt.err (!%p430_p7)
}
 0x2d2   :  { %s440_s1 = smov 128   ;;  %s441_s12 = smov 8  }
 0x2d3   :  { %342 = dma.vmem_to_hbm [thread:$0]  %s337_s27, 256, %s552_s7, [#allocation3], %s440_s1, %s440_s1, %s441_s12  }
 0x2d4   :  { %434 = dma.done.wait [#allocation3], 256  }
 0x2d5   :  { %435 = vsyncadd [#allocation3], 4294967040 }
 0x2d6   :  { %346 = vsyncpa [#allocation3], 1 }

</bundles_post_ra>
